<compile_context>
chip_gen: v5e
topology: v5e:2x2
jax: 0.10.0
libtpu: 0.0.40
codegen_flags: <defaults>
</compile_context>

<pallas_src>
import jax
import jax.numpy as jnp
from jax.experimental import pallas as pl
from jax.experimental.pallas import tpu as pltpu


# ---------------------------------------------------------------------------
# Single-step cell kernel (matches the module's forward exactly).
# ---------------------------------------------------------------------------
def _cfc_cell_kernel(x_ref, h_ref, t_ref,
                     w0x_ref, w0h_ref, b0_ref,      # backbone input layer (split)
                     w1_ref, b1_ref,                # backbone hidden layer
                     wheads_ref, bheads_ref,        # fused heads [g | f+tau | h]
                     out_ref):
    H = out_ref.shape[1]

    # backbone: (x@W0x + h@W0h + b0) -> ReLU -> Linear -> ReLU
    z = (jnp.dot(x_ref[...], w0x_ref[...], preferred_element_type=jnp.float32)
         + jnp.dot(h_ref[...], w0h_ref[...], preferred_element_type=jnp.float32)
         + b0_ref[...])
    z = jnp.maximum(z, 0.0)
    z = jnp.dot(z, w1_ref[...], preferred_element_type=jnp.float32) + b1_ref[...]
    z = jnp.maximum(z, 0.0)

    # one fused head matmul, then slice the three heads out of the lane axis
    heads = (jnp.dot(z, wheads_ref[...], preferred_element_type=jnp.float32)
             + bheads_ref[...])
    g  = jnp.tanh(heads[:, 0:H])            # head_g
    ft = heads[:, H:2 * H]                  # head_f + tau (pre-folded weights)
    hh = jnp.tanh(heads[:, 2 * H:3 * H])    # head_h

    sigma = jax.nn.sigmoid(ft * t_ref[...])             # t broadcast over hidden
    out_ref[...] = hh + sigma * (g - hh)                 # == hh*(1-s) + g*s


def cfc_improved_cell(x, h, t, prep):
    """Single step. x: (B,in), h: (B,hidden), t: (B,) or (B,1) -> (B,hidden) f32."""
    B = x.shape[0]
    H = prep["w0h"].shape[0]
    t2 = t.reshape(B, 1).astype(jnp.float32)

    args = (x.astype(jnp.float32), h.astype(jnp.float32), t2,
            prep["w0x"], prep["w0h"], prep["b0"],
            prep["w1"], prep["b1"],
            prep["wheads"], prep["bheads"])

    vmem = pl.BlockSpec(memory_space=pltpu.MemorySpace.VMEM)
    return pl.pallas_call(
        _cfc_cell_kernel,
        out_shape=jax.ShapeDtypeStruct((B, H), jnp.float32),
        in_specs=[vmem] * len(args),
        out_specs=vmem,
    )(*args)


# ---------------------------------------------------------------------------
# Recurrent variant: whole sequence in one pallas_call, weights + h resident.
# ---------------------------------------------------------------------------
def _cfc_seq_kernel(x_ref, t_ref, h0_ref,
                    w0x_ref, w0h_ref, b0_ref,
                    w1_ref, b1_ref,
                    wheads_ref, bheads_ref,
                    out_ref, h_state):
    s = pl.program_id(0)
    H = h_state.shape[1]

    @pl.when(s == 0)
    def _():
        h_state[...] = h0_ref[...]

    x = x_ref[0]                # (B, in)   this step's input
    t = t_ref[0]                # (B, 1)
    h = h_state[...]            # carried hidden state (VMEM-resident)

    z = (jnp.dot(x, w0x_ref[...], preferred_element_type=jnp.float32)
         + jnp.dot(h, w0h_ref[...], preferred_element_type=jnp.float32)
         + b0_ref[...])
    z = jnp.maximum(z, 0.0)
    z = jnp.dot(z, w1_ref[...], preferred_element_type=jnp.float32) + b1_ref[...]
    z = jnp.maximum(z, 0.0)

    heads = (jnp.dot(z, wheads_ref[...], preferred_element_type=jnp.float32)
             + bheads_ref[...])
    g  = jnp.tanh(heads[:, 0:H])
    ft = heads[:, H:2 * H]
    hh = jnp.tanh(heads[:, 2 * H:3 * H])

    sigma = jax.nn.sigmoid(ft * t)
    h_new = hh + sigma * (g - hh)

    h_state[...] = h_new
    out_ref[0] = h_new


def cfc_improved_sequence(x_seq, h0, t_seq, prep):
    """x_seq: (T,B,in), h0: (B,hidden), t_seq: (T,B) -> all hidden states (T,B,hidden)."""
    T, B, IN = x_seq.shape
    H = prep["w0h"].shape[0]
    t3 = t_seq.reshape(T, B, 1).astype(jnp.float32)

    def resident(arr):  # full-array block, same block every step -> stays in VMEM
        return pl.BlockSpec(arr.shape, lambda s: (0, 0))

    grid_spec = pltpu.PrefetchScalarGridSpec(
        num_scalar_prefetch=0,
        grid=(T,),
        in_specs=[
            pl.BlockSpec((1, B, IN), lambda s: (s, 0, 0)),   # x_t streamed
            pl.BlockSpec((1, B, 1), lambda s: (s, 0, 0)),    # t_t streamed
            resident(h0),
            resident(prep["w0x"]), resident(prep["w0h"]), resident(prep["b0"]),
            resident(prep["w1"]), resident(prep["b1"]),
            resident(prep["wheads"]), resident(prep["bheads"]),
        ],
        out_specs=pl.BlockSpec((1, B, H), lambda s: (s, 0, 0)),
        scratch_shapes=[pltpu.VMEM((B, H), jnp.float32)],    # carried hidden state
    )
    return pl.pallas_call(
        _cfc_seq_kernel,
        out_shape=jax.ShapeDtypeStruct((T, B, H), jnp.float32),
        grid_spec=grid_spec,
        compiler_params=pltpu.CompilerParams(dimension_semantics=("arbitrary",)),
    )(x_seq.astype(jnp.float32), t3, h0.astype(jnp.float32),
      prep["w0x"], prep["w0h"], prep["b0"],
      prep["w1"], prep["b1"], prep["wheads"], prep["bheads"])


# ---------------------------------------------------------------------------
# Parameter construction (PyTorch-layout) and one-time fusion/prep.
# ---------------------------------------------------------------------------
def init_params(key, in_features, hidden_features, backbone_features):
    """Deterministic synthetic parameters (same shapes as the PyTorch module)."""
    ks = jax.random.split(key, 12)
    d_in = in_features + hidden_features

    def lin(kw, kb, fin, fout):
        w = jax.random.normal(kw, (fin, fout), jnp.float32) * (1.0 / jnp.sqrt(fin))
        b = jax.random.normal(kb, (1, fout), jnp.float32) * 0.01
        return w, b

    w0, b0 = lin(ks[0], ks[1], d_in, backbone_features)
    w1, b1 = lin(ks[2], ks[3], backbone_features, backbone_features)
    wg, bg = lin(ks[4], ks[5], backbone_features, hidden_features)
    wf, bf = lin(ks[6], ks[7], backbone_features, hidden_features)
    wh, bh = lin(ks[8], ks[9], backbone_features, hidden_features)
    wt, bt = lin(ks[10], ks[11], backbone_features, hidden_features)
    return dict(w0=w0, b0=b0, w1=w1, b1=b1, wg=wg, bg=bg,
                wf=wf, bf=bf, wh=wh, bh=bh, wt=wt, bt=bt)


def prepare_params(p, in_features):
    """One-time algebraic fusion: split w0 and fuse heads [g | f+tau | h]."""
    w0x = p["w0"][:in_features, :]
    w0h = p["w0"][in_features:, :]
    wheads = jnp.concatenate([p["wg"], p["wf"] + p["wt"], p["wh"]], axis=1)
    bheads = jnp.concatenate([p["bg"], p["bf"] + p["bt"], p["bh"]], axis=1)
    return dict(w0x=w0x, w0h=w0h, b0=p["b0"], w1=p["w1"], b1=p["b1"],
                wheads=wheads, bheads=bheads)


def cfc_reference(x, h, t, p):
    """Pure-JAX reference mirroring the PyTorch forward (un-fused params)."""
    B = x.shape[0]
    t2 = t.reshape(B, 1)
    z = jnp.concatenate([x, h], axis=1)
    z = jax.nn.relu(z @ p["w0"] + p["b0"])
    z = jax.nn.relu(z @ p["w1"] + p["b1"])
    g = jnp.tanh(z @ p["wg"] + p["bg"])
    f = z @ p["wf"] + p["bf"]
    hh = jnp.tanh(z @ p["wh"] + p["bh"])
    tau = z @ p["wt"] + p["bt"]
    sigma = jax.nn.sigmoid((tau + f) * t2)
    return hh * (1.0 - sigma) + g * sigma


if __name__ == "__main__":
    # Small shapes consistent with the module's forward:
    #   x: (B, in_features), h: (B, hidden_features), t: (B,)
    # backbone_depth=2 -> exactly one extra (Linear, ReLU) pair (depth>2 in the
    # PyTorch module would reuse the SAME layer; depth=2 avoids that subtlety).
    B, IN, H, BK = 8, 16, 32, 64
    T = 12  # sequence length for the recurrent variant

    key = jax.random.PRNGKey(0)
    kx, kh, kt, kp, kxs, kts = jax.random.split(key, 6)
    x = jax.random.normal(kx, (B, IN), jnp.float32)
    h = jax.random.normal(kh, (B, H), jnp.float32)
    t = jax.random.uniform(kt, (B,), jnp.float32)

    raw = init_params(kp, IN, H, BK)
    prep = prepare_params(raw, IN)

    # --- single step ---
    h_new = jax.block_until_ready(cfc_improved_cell(x, h, t, prep))
    ref = cfc_reference(x, h, t, raw)
    assert h_new.shape == (B, H)
    assert jnp.allclose(h_new, ref, atol=2e-5, rtol=1e-5), "single-step mismatch"

    # --- full sequence in one pallas_call (weights & h resident in VMEM) ---
    x_seq = jax.random.normal(kxs, (T, B, IN), jnp.float32)
    t_seq = jax.random.uniform(kts, (T, B), jnp.float32)
    h_all = jax.block_until_ready(cfc_improved_sequence(x_seq, h, t_seq, prep))

    def _scan_step(hc, xt):
        xs, ts = xt
        hn = cfc_reference(xs, hc, ts, raw)
        return hn, hn
    _, ref_seq = jax.lax.scan(_scan_step, h, (x_seq, t_seq))
    assert h_all.shape == (T, B, H)
    assert jnp.allclose(h_all, ref_seq, atol=1e-4, rtol=1e-4), "sequence mismatch"

    print("KERNEL_OK")
</pallas_src>

<mosaic_0001>
module attributes {stable_mosaic.version = 11 : i64} {
  func.func @_cfc_cell_kernel(%arg0: memref<8x16xf32, #tpu.memory_space<vmem>>, %arg1: memref<8x32xf32, #tpu.memory_space<vmem>>, %arg2: memref<8x1xf32, #tpu.memory_space<vmem>>, %arg3: memref<16x64xf32, #tpu.memory_space<vmem>>, %arg4: memref<32x64xf32, #tpu.memory_space<vmem>>, %arg5: memref<1x64xf32, #tpu.memory_space<vmem>>, %arg6: memref<64x64xf32, #tpu.memory_space<vmem>>, %arg7: memref<1x64xf32, #tpu.memory_space<vmem>>, %arg8: memref<64x96xf32, #tpu.memory_space<vmem>>, %arg9: memref<1x96xf32, #tpu.memory_space<vmem>>, %arg10: memref<8x32xf32, #tpu.memory_space<vmem>>) attributes {dimension_semantics = [], scalar_prefetch = 0 : i64, scratch_operands = 0 : i64, tpu.core_type = #tpu.core_type<tc>} {
    %c0 = arith.constant 0 : index
    %c0_0 = arith.constant 0 : index
    %0 = vector.load %arg0[%c0, %c0_0] : memref<8x16xf32, #tpu.memory_space<vmem>>, vector<8x16xf32>
    %c0_1 = arith.constant 0 : index
    %c0_2 = arith.constant 0 : index
    %1 = vector.load %arg3[%c0_1, %c0_2] : memref<16x64xf32, #tpu.memory_space<vmem>>, vector<16x64xf32>
    %cst = arith.constant dense<0.000000e+00> : vector<8x64xf32>
    %2 = tpu.matmul %0, %1, %cst {dimension_numbers = #tpu.dot_dimension_numbers<[1], [0], [0], [1], [0, 0, 1, 1], [], []>} : vector<8x16xf32>, vector<16x64xf32>, vector<8x64xf32> -> vector<8x64xf32>
    %c0_3 = arith.constant 0 : index
    %c0_4 = arith.constant 0 : index
    %3 = vector.load %arg1[%c0_3, %c0_4] : memref<8x32xf32, #tpu.memory_space<vmem>>, vector<8x32xf32>
    %c0_5 = arith.constant 0 : index
    %c0_6 = arith.constant 0 : index
    %4 = vector.load %arg4[%c0_5, %c0_6] : memref<32x64xf32, #tpu.memory_space<vmem>>, vector<32x64xf32>
    %cst_7 = arith.constant dense<0.000000e+00> : vector<8x64xf32>
    %5 = tpu.matmul %3, %4, %cst_7 {dimension_numbers = #tpu.dot_dimension_numbers<[1], [0], [0], [1], [0, 0, 1, 1], [], []>} : vector<8x32xf32>, vector<32x64xf32>, vector<8x64xf32> -> vector<8x64xf32>
    %6 = arith.addf %2, %5 : vector<8x64xf32>
    %c0_8 = arith.constant 0 : index
    %c0_9 = arith.constant 0 : index
    %7 = vector.load %arg5[%c0_8, %c0_9] : memref<1x64xf32, #tpu.memory_space<vmem>>, vector<1x64xf32>
    %8 = vector.broadcast %7 : vector<1x64xf32> to vector<8x64xf32>
    %9 = arith.addf %6, %8 : vector<8x64xf32>
    %cst_10 = arith.constant 0.000000e+00 : f32
    %10 = vector.broadcast %cst_10 : f32 to vector<8x64xf32>
    %11 = arith.maximumf %9, %10 : vector<8x64xf32>
    %c0_11 = arith.constant 0 : index
    %c0_12 = arith.constant 0 : index
    %12 = vector.load %arg6[%c0_11, %c0_12] : memref<64x64xf32, #tpu.memory_space<vmem>>, vector<64x64xf32>
    %cst_13 = arith.constant dense<0.000000e+00> : vector<8x64xf32>
    %13 = tpu.matmul %11, %12, %cst_13 {dimension_numbers = #tpu.dot_dimension_numbers<[1], [0], [0], [1], [0, 0, 1, 1], [], []>} : vector<8x64xf32>, vector<64x64xf32>, vector<8x64xf32> -> vector<8x64xf32>
    %c0_14 = arith.constant 0 : index
    %c0_15 = arith.constant 0 : index
    %14 = vector.load %arg7[%c0_14, %c0_15] : memref<1x64xf32, #tpu.memory_space<vmem>>, vector<1x64xf32>
    %15 = vector.broadcast %14 : vector<1x64xf32> to vector<8x64xf32>
    %16 = arith.addf %13, %15 : vector<8x64xf32>
    %cst_16 = arith.constant 0.000000e+00 : f32
    %17 = vector.broadcast %cst_16 : f32 to vector<8x64xf32>
    %18 = arith.maximumf %16, %17 : vector<8x64xf32>
    %c0_17 = arith.constant 0 : index
    %c0_18 = arith.constant 0 : index
    %19 = vector.load %arg8[%c0_17, %c0_18] : memref<64x96xf32, #tpu.memory_space<vmem>>, vector<64x96xf32>
    %cst_19 = arith.constant dense<0.000000e+00> : vector<8x96xf32>
    %20 = tpu.matmul %18, %19, %cst_19 {dimension_numbers = #tpu.dot_dimension_numbers<[1], [0], [0], [1], [0, 0, 1, 1], [], []>} : vector<8x64xf32>, vector<64x96xf32>, vector<8x96xf32> -> vector<8x96xf32>
    %c0_20 = arith.constant 0 : index
    %c0_21 = arith.constant 0 : index
    %21 = vector.load %arg9[%c0_20, %c0_21] : memref<1x96xf32, #tpu.memory_space<vmem>>, vector<1x96xf32>
    %22 = vector.broadcast %21 : vector<1x96xf32> to vector<8x96xf32>
    %23 = arith.addf %20, %22 : vector<8x96xf32>
    %24 = vector.extract_strided_slice %23 {offsets = [0, 0], sizes = [8, 32], strides = [1, 1]} : vector<8x96xf32> to vector<8x32xf32>
    %25 = math.tanh %24 : vector<8x32xf32>
    %26 = vector.extract_strided_slice %23 {offsets = [0, 32], sizes = [8, 32], strides = [1, 1]} : vector<8x96xf32> to vector<8x32xf32>
    %27 = vector.extract_strided_slice %23 {offsets = [0, 64], sizes = [8, 32], strides = [1, 1]} : vector<8x96xf32> to vector<8x32xf32>
    %28 = math.tanh %27 : vector<8x32xf32>
    %c0_22 = arith.constant 0 : index
    %c0_23 = arith.constant 0 : index
    %29 = vector.load %arg2[%c0_22, %c0_23] : memref<8x1xf32, #tpu.memory_space<vmem>>, vector<8x1xf32>
    %30 = vector.broadcast %29 : vector<8x1xf32> to vector<8x32xf32>
    %31 = arith.mulf %26, %30 : vector<8x32xf32>
    %32 = arith.negf %31 : vector<8x32xf32>
    %33 = math.exp %32 : vector<8x32xf32>
    %cst_24 = arith.constant 1.000000e+00 : f32
    %34 = vector.broadcast %cst_24 : f32 to vector<8x32xf32>
    %35 = arith.addf %34, %33 : vector<8x32xf32>
    %36 = arith.divf %34, %35 : vector<8x32xf32>
    %37 = arith.subf %25, %28 : vector<8x32xf32>
    %38 = arith.mulf %36, %37 : vector<8x32xf32>
    %39 = arith.addf %28, %38 : vector<8x32xf32>
    %c0_25 = arith.constant 0 : index
    %c0_26 = arith.constant 0 : index
    %40 = vector.load %arg10[%c0_25, %c0_26] : memref<8x32xf32, #tpu.memory_space<vmem>>, vector<8x32xf32>
    tpu.vector_store %arg10[%c0_25, %c0_26], %39 {strides = array<i32>} : memref<8x32xf32, #tpu.memory_space<vmem>>, vector<8x32xf32>,
    return
  }
}

</mosaic_0001>

<bundles_post_ra>
// kernel: tpu_custom_call.1
= control target key start
LH: loop header
LB: loop body
LE: loop exit
PB: predicated region body
PF: predicated region fallthrough
CT: control target
= control target key end

     0   :  { %15 = vsyncpa [#allocation3], 0  ;;  %s593_s0 = inlined_call_operand.vmem [shape: f32[8,16], index: 0, kind: input, shape index: {}]   ;;  %s594_s1 = inlined_call_operand.hbm [shape: f32[8,32], index: 1, kind: input, shape index: {}]   ;;  %s595_s2 = inlined_call_operand.vmem [shape: f32[8,1], index: 2, kind: input, shape index: {}]   ;;  %s596_s3 = inlined_call_operand.hbm [shape: f32[16,64], index: 3, kind: input, shape index: {}]   ;;  %s597_s4 = inlined_call_operand.hbm [shape: f32[32,64], index: 4, kind: input, shape index: {}]   ;;  %s598_s5 = inlined_call_operand.vmem [shape: f32[1,64], index: 5, kind: input, shape index: {}]   ;;  %s599_s6 = inlined_call_operand.hbm [shape: f32[64,64], index: 6, kind: input, shape index: {}]   ;;  %s600_s7 = inlined_call_operand.vmem [shape: f32[1,64], index: 7, kind: input, shape index: {}]   ;;  %s601_s8 = inlined_call_operand.hbm [shape: f32[64,96], index: 8, kind: input, shape index: {}]   ;;  %s602_s9 = inlined_call_operand.vmem [shape: f32[1,96], index: 9, kind: input, shape index: {}]   ;;  %s603_s10 = inlined_call_operand.hbm [shape: f32[8,32], index: 10, kind: output, shape index: {}]  }
   0x1   :  { %16 = vsyncpa [#allocation6], 0 }
   0x2   :  { %17 = vsyncpa [#allocation9], 0  ;;  %s38_s15 = sshll.u32 %s596_s3, 4  ;;  %s39_s15 = int_to_ptr.hbm [resolvable:$true] %s38_s15 }
   0x3   :  { %18 = vsyncpa [#allocation4], 0  ;;  %s490_s16 = smov [#allocation5]   ;;  %s66_s20 = sshll.u32 %s599_s6, 4  ;;  %s67_s20 = int_to_ptr.hbm [resolvable:$true] %s66_s20 }
   0x4   :  { %s40_s17 = sshll.u32 %s490_s16, 4  ;;  %s491_s21 = smov 128   ;;  %s41_s17 = int_to_ptr.vmem [resolvable:$true] %s40_s17 }
   0x5   :  { %s492_s22 = smov 8   ;;  %s493_s23 = smov [#allocation8]  }
   0x6   :  { %46 = dma.hbm_to_vmem [thread:$0]  %s39_s15, 256, %s41_s17, [#allocation6], %s491_s21, %s491_s21, %s492_s22  }
   0x7   :  { %s68_s24 = sshll.u32 %s493_s23, 4  ;;  %s26_s27 = sshll.u32 %s594_s1, 4  ;;  %s69_s24 = int_to_ptr.vmem [resolvable:$true] %s68_s24  ;;  %s27_s27 = int_to_ptr.hbm [resolvable:$true] %s26_s27 }
   0x8   :  { %74 = dma.hbm_to_vmem [thread:$0]  %s67_s20, 1024, %s69_s24, [#allocation9], %s491_s21, %s491_s21, %s492_s22  }
   0x9   :  { %s51_s29 = sshll.u32 %s597_s4, 4  ;;  %s494_s30 = smov [#allocation2]   ;;  %s52_s29 = int_to_ptr.hbm [resolvable:$true] %s51_s29 }
   0xa   :  { %s28_s11 = sshll.u32 %s494_s30, 4  ;;  %s495_s6 = smov [#allocation7]   ;;  %s29_s11 = int_to_ptr.vmem [resolvable:$true] %s28_s11 }
   0xb   :  { %31 = dma.hbm_to_vmem [thread:$0]  %s27_s27, 128, %s29_s11, [#allocation3]  }
   0xc   :  { %s53_s12 = sshll.u32 %s495_s6, 4  ;;  %s81_s15 = sshll.u32 %s601_s8, 4  ;;  %s54_s12 = int_to_ptr.vmem [resolvable:$true] %s53_s12  ;;  %s82_s15 = int_to_ptr.hbm [resolvable:$true] %s81_s15 }
   0xd   :  { %59 = dma.hbm_to_vmem [thread:$0]  %s52_s29, 512, %s54_s12, [#allocation6], %s491_s21, %s491_s21, %s492_s22  }
   0xe   :  { %s496_s1 = smov [#allocation10]  }
   0xf   :  { %s83_s16 = sshll.u32 %s496_s1, 4  ;;  %s84_s16 = int_to_ptr.vmem [resolvable:$true] %s83_s16 }
  0x10   :  { %89 = dma.hbm_to_vmem [thread:$0]  %s82_s15, 1024, %s84_s16, [#allocation9], %s491_s21, %s491_s21, %s492_s22  }
  0x11   :  { %482 = dma.done.wait [#allocation3], 128  }
  0x12   :  { %483 = vsyncadd [#allocation3], 4294967168 }
  0x13   :  { %484 = dma.done.wait [#allocation6], 768  }
  0x14   :  { %485 = vsyncadd [#allocation6], 4294966528 }
  0x15   :  { %486 = dma.done.wait [#allocation9], 2048  }
  0x16   :  { %487 = vsyncadd [#allocation9], 4294965248  ;;  %v119_v0 = vld [vmem:[#allocation7 + $0x18] sm:$0xff]  ;;  %v118_v1 = vld [vmem:[#allocation7 + $0x10] sm:$0xff]  ;;  %vm144_vm0 = vcmask 130048   ;;  %vm120_vm1 = vcmask 261120  }
  0x17   :  { %136 = vmatpush.msra.mxu0 %v119_v0  ;;  %v114_v2 = vld [vmem:[#allocation5 + $0x8] sm:$0xff]  ;;  %v113_v3 = vld [vmem:[#allocation5] sm:$0xff]  ;;  %v117_v4 = vld [vmem:[#allocation7 + $0x8] sm:$0xff]  ;;  %vm186_vm2 = vcmask 523264   ;;  %v497_v34 = vmov 0   ;;  %s498_s21 = smov 64  }
  0x18   :  { %162 = vmatpush.msra.mxu1 %v114_v2  ;;  %v112_v5 = vld [vmem:[%s593_s0] sm:$0xff]  ;;  %v181_v6 = vld [vmem:[#allocation8 + $0x38] sm:$0xff]  ;;  %v116_v7 = vld [vmem:[#allocation7] sm:$0xff]  ;;  %328 = vset.pattern.permute.xlu0 %v497_v34  ;;  %s300_s26 = sshll.u32 %s603_s10, 4  ;;  %s301_s26 = int_to_ptr.hbm [resolvable:$true] %s300_s26 }
  0x19   :  { %137 = vmatpush.msra.mxu0 %v118_v1  ;;  %198 = vmatpush.msra.mxu2 %v181_v6  ;;  %v180_v8 = vld [vmem:[#allocation8 + $0x30] sm:$0xff]  ;;  %v115_v9 = vld [vmem:[#allocation2] sm:$0xff]  ;;  %v178_v11 = vld [vmem:[#allocation8 + $0x20] sm:$0xff] }
  0x1a   :  { %163 = vmatpush.msra.mxu1 %v113_v3  ;;  %v179_v10 = vld [vmem:[#allocation8 + $0x28] sm:$0xff]  ;;  %v177_v12 = vld [vmem:[#allocation8 + $0x18] sm:$0xff]  ;;  %v176_v13 = vld [vmem:[#allocation8 + $0x10] sm:$0xff] }
  0x1b   :  { %138 = vmatpush.msra.mxu0 %v117_v4  ;;  %313 = vmatmul.msk.f32.vlgmr.msra.gmra.mxu1 %vm144_vm0, %v112_v5  ;;  %v175_v14 = vld [vmem:[#allocation8 + $0x8] sm:$0xff]  ;;  %v174_v15 = vld [vmem:[#allocation8] sm:$0xff]  ;;  %v218_v16 = vld [vmem:[#allocation10 + $0x38] sm:$0xff] }
  0x1c   :  { %199 = vmatpush.msra.mxu2 %v180_v8  ;;  %v217_v17 = vld [vmem:[#allocation10 + $0x30] sm:$0xff]  ;;  %234 = vmatpush.msra.mxu3 %v218_v16  ;;  %v216_v18 = vld [vmem:[#allocation10 + $0x28] sm:$0xff]  ;;  %v215_v19 = vld [vmem:[#allocation10 + $0x20] sm:$0xff] }
  0x1d   :  { %139 = vmatpush.msra.mxu0 %v116_v7  ;;  %v214_v20 = vld [vmem:[#allocation10 + $0x18] sm:$0xff]  ;;  %v329_v22 = vld [vmem:[%s598_s5] ss:$0 sm:$0xff]  ;;  %v213_v27 = vld [vmem:[#allocation10 + $0x10] sm:$0xff] }
  0x1e   :  { %312 = vmatmul.msk.f32.vlgmr.msra.gmra.mxu0 %vm120_vm1, %v115_v9  ;;  %200 = vmatpush.msra.mxu2 %v179_v10  ;;  %v212_v28 = vld [vmem:[#allocation10 + $0x8] sm:$0xff]  ;;  %v211_v29 = vld [vmem:[#allocation10] sm:$0xff] }
  0x1f   :  { %235 = vmatpush.msra.mxu3 %v217_v17  ;;  %v330_v30 = vld [vmem:[%s600_s7] ss:$0 sm:$0xff]  ;;  %s499_s7 = smov 32  }
  0x20   :  { %201 = vmatpush.msra.mxu2 %v178_v11  ;;  %v331_v35 = vld [vmem:[%s602_s9] ss:$0 sm:$0xff] }
  0x21   :  { %236 = vmatpush.msra.mxu3 %v216_v18  ;;  %v247_v39 = vld [vmem:[%s595_s2] sm:$0xff]  ;;  %s500_s2 = smov [#allocation11]  }
  0x22   :  { %202 = vmatpush.msra.mxu2 %v177_v12  ;;  %s298_s9 = sshll.u32 %s500_s2, 4  ;;  %s299_s9 = int_to_ptr.vmem [resolvable:$true] %s298_s9 }
  0x23   :  { %237 = vmatpush.msra.mxu3 %v215_v19 }
  0x24   :  { %203 = vmatpush.msra.mxu2 %v176_v13 }
  0x25   :  { %238 = vmatpush.msra.mxu3 %v214_v20 }
  0x26   :  { %204 = vmatpush.msra.mxu2 %v175_v14 }
  0x27   :  { %239 = vmatpush.msra.mxu3 %v213_v27 }
  0x28   :  { %205 = vmatpush.msra.mxu2 %v174_v15 }
  0x29   :  { %240 = vmatpush.msra.mxu3 %v212_v28 }
  0x2b   :  { %241 = vmatpush.msra.mxu3 %v211_v29 }
  0x98   :  { %v165_v21 = vpop.f32.mrf.mxu1 }
  0x9b   :  { %v141_v23 = vpop.f32.mrf.mxu0 }
  0x9c   :  { %v166_v24 = vadd.f32 %v165_v21, %v141_v23 }
  0x9e   :  { %v172_v25 = vadd.f32 %v329_v22, %v166_v24 }
  0xa0   :  { %v173_v26 = vmax.f32 %v172_v25, 0.0 }
  0xa2   :  { %314 = vmatmul.msk.f32.vlgmr.msra.gmra.mxu2 %vm186_vm2, %v173_v26 }
 0x125   :  { %v207_v31 = vpop.f32.mrf.mxu2 }
 0x126   :  { %v208_v32 = vadd.f32 %v330_v30, %v207_v31 }
 0x128   :  { %v210_v33 = vmax.f32 %v208_v32, 0.0 }
 0x12a   :  { %315 = vmatmul.msk.f32.vlgmr.msra.gmra.mxu3 %vm186_vm2, %v210_v33 }
 0x1ad   :  { %v243_v36 = vpop.f32.mrf.mxu3 }
 0x1ae   :  { %v244_v37 = vadd.f32 %v331_v35, %v243_v36 }
 0x1b0   :  { %332 = vtanh.f32 %v244_v37 }
 0x1b6   :  { %v333_v38 = vpop.eup %332 }
 0x1b7   :  { %274 = vrot.lane.b32.xlu0 %v333_v38, %s498_s21 }
 0x1bf   :  { %250 = vperm.xlu0 %328, %v247_v39  }
 0x229   :  { %v275_v40 = vpop.permute.xlu0 %274 }
 0x22a   :  { %v277_v41 = vsub.f32 %v333_v38, %v275_v40 }
 0x22c   :  { %279 = vrot.lane.b32.xlu1 %v277_v41, %s499_s7 }
 0x231   :  { %v251_v42 = vpop.permute.xlu0 %250 }
 0x232   :  { %v253_v43 = vmul.f32 %v251_v42, %v244_v37 }
 0x234   :  { %v316_v44 = vmul.f32 -1.442695, %v253_v43 }
 0x236   :  { %334 = vpow2.f32 %v316_v44 }
 0x23c   :  { %v335_v45 = vpop.eup %334 }
 0x23d   :  { %v257_v46 = vadd.f32 1.0, %v335_v45 }
 0x23f   :  { %336 = vrcp.f32 %v257_v46  ;;  %v269_v52 = vand.u32 2147483648, %v257_v46  ;;  %vm263_vm4 = vweird.f32 %v257_v46  ;;  %v267_v53 = vand.u32 2147483647, %v257_v46 }
 0x241   :  { %v270_v55 = vor.u32 1.1754944e-38, %v269_v52  ;;  %vm268_vm6 = vcmp.eq.f32.partialorder %v267_v53, 8.507059e+37 }
 0x245   :  { %v337_v47 = vpop.eup %336 }
 0x246   :  { %v259_v48 = vmul.f32 %v337_v47, %v257_v46  ;;  %vm264_vm3 = vweird.f32 %v337_v47 }
 0x247   :  { %vm265_vm5 = vmor %vm263_vm4, %vm264_vm3 }
 0x248   :  { %v260_v49 = vsub.f32 1.0, %v259_v48 }
 0x24a   :  { %v261_v50 = vmul.f32 %v337_v47, %v260_v49 }
 0x24c   :  { %v262_v51 = vadd.f32 %v337_v47, %v261_v50 }
 0x24e   :  { %v266_v54 = vsel %vm265_vm5, %v337_v47, %v262_v51 }
 0x24f   :  { %v271_v57 = vsel %vm268_vm6, %v270_v55, %v266_v54 }
 0x29e   :  { %v280_v56 = vpop.permute.xlu1 %279 }
 0x29f   :  { %v282_v58 = vmul.f32 %v280_v56, %v271_v57 }
 0x2a1   :  { %284 = vrot.lane.b32.xlu1 %v282_v58, %s499_s7 }
 0x313   :  { %v285_v59 = vpop.permute.xlu1 %284 }
 0x314   :  { %v287_v60 = vadd.f32 %v333_v38, %v285_v59 }
 0x316   :  { %289 = vrot.lane.b32.xlu2 %v287_v60, %s498_s21 }
 0x370   :  { %v290_v61 = vpop.permute.xlu2 %289 }
 0x371   :  { %292 = vst.msk [vmem:[#allocation11] sm:$0xff] %vm120_vm1, %v290_v61 }
 0x372   :  { %303 = dma.vmem_to_hbm [thread:$0]  %s299_s9, 128, %s301_s26, [#allocation4]  }
 0x373   :  { %488 = dma.done.wait [#allocation4], 128  }
 0x374   :  { %489 = vsyncadd [#allocation4], 4294967168 }
 0x375   :  { %308 = vsyncpa [#allocation3], 1 }
 0x376   :  { %309 = vsyncpa [#allocation6], 1 }
 0x377   :  { %310 = vsyncpa [#allocation9], 1 }
 0x378   :  { %311 = vsyncpa [#allocation4], 1 }

</bundles_post_ra>
